<compile_context>
chip_gen: v5e
topology: v5e:2x2
jax: 0.10.0
libtpu: 0.0.40
codegen_flags: <defaults>
</compile_context>

<pallas_src>
import jax
import jax.numpy as jnp
from jax.experimental import pallas as pl
from jax.experimental.pallas import tpu as pltpu

G = 8  # logical rows packed per lane-dense VMEM row (sublane pack factor)


def _round_up(n, m):
    return ((n + m - 1) // m) * m


def _mlp_kernel(x_ref, w1_ref, b1_ref, w2_ref, b2_ref, w3_ref, b3_ref, o_ref):
    # Packed layer 1: (TBP, 8F) @ (8F, 8*64) on the MXU, f32 accumulation; the
    # block-diagonal W1 keeps every packed lane-group an independent logical row.
    h1 = jnp.dot(x_ref[...], w1_ref[...], preferred_element_type=jnp.float32)
    h1 = jnp.maximum(h1 + b1_ref[...], 0.0)
    # Dropout(0.2): identity in eval mode.
    # Packed layer 2: (TBP, 8*64) @ (8*64, 8*32), block-diagonal W2.
    h2 = jnp.dot(h1, w2_ref[...], preferred_element_type=jnp.float32)
    h2 = jnp.maximum(h2 + b2_ref[...], 0.0)
    # Packed layer 3: (TBP, 8*32) @ (8*32, 8) -> (TBP, 8). Column p of W3bd holds w3 in
    # rows [32p, 32p+32), so out[r, p] = MLP(row 8r+p): the result is already laid out so
    # that a row-major flatten is the (B,) output -- no sublane->lane relayout needed.
    out = jnp.dot(h2, w3_ref[...], preferred_element_type=jnp.float32) + b3_ref[0, 0]
    o_ref[...] = out.astype(o_ref.dtype)


def f1_predictor_forward(x, params):
    """Fused 3-layer MLP forward. x: (B, input_size) f32 -> (B, 1) f32."""
    w1, b1, w2, b2, w3, b3 = params
    B, F = x.shape
    H1, H2 = w1.shape[1], w2.shape[1]

    # Row padding: only what packing needs (<= 7 rows), or up to 64 rows on the tiny
    # single-tile path so packed-row counts stay 8-aligned. Padded rows are independent
    # (block-diagonal weights) and sliced off before return.
    if B <= 1024:
        b_pad = _round_up(B, 64)
    else:
        b_pad = _round_up(B, G)
    if b_pad != B:
        x = jnp.pad(x, ((0, b_pad - B), (0, 0)))
    R = b_pad // G                       # packed rows
    xp = x.reshape(R, G * F)             # free, contiguous reshape: lane-dense x rows

    # Tile selection (in packed rows). Big tiles amortize per-step overhead; mid-size
    # batches get >= 2 (even) grid steps so v7x's two TensorCores both get work.
    if B <= 1024:
        tbp = R
        num_tiles = 1
    else:
        tile_rows = min(8192, _round_up(pl.cdiv(b_pad, 2), 512))
        tbp = tile_rows // G
        num_tiles = pl.cdiv(R, tbp)      # last block may be ragged; Pallas handles it

    # Block-diagonal / tiled weights: each packed lane-group is an independent row.
    eye = jnp.eye(G, dtype=jnp.float32)
    w1bd = jnp.kron(eye, w1.astype(jnp.float32))            # (G*F,  G*H1)
    w2bd = jnp.kron(eye, w2.astype(jnp.float32))            # (G*H1, G*H2)
    w3bd = jnp.kron(eye, w3.reshape(H2, 1).astype(jnp.float32))  # (G*H2, G)
    b1t = jnp.tile(b1.reshape(1, H1).astype(jnp.float32), (1, G))  # (1, G*H1)
    b2t = jnp.tile(b2.reshape(1, H2).astype(jnp.float32), (1, G))  # (1, G*H2)
    b3s = jnp.reshape(b3, (1, 1)).astype(jnp.float32)              # SMEM scalar

    flops = 2 * b_pad * (F * H1 + H1 * H2 + H2)
    bytes_accessed = (b_pad * F * 4 + b_pad * 4
                      + (G * F * G * H1 + G * H1 * G * H2 + G * H2 * G) * 4
                      + (G * H1 + G * H2 + 1) * 4)

    out_packed = pl.pallas_call(
        _mlp_kernel,
        out_shape=jax.ShapeDtypeStruct((R, G), jnp.float32),
        grid=(num_tiles,),
        in_specs=[
            pl.BlockSpec((tbp, G * F), lambda i: (i, 0)),        # x: batch-tiled, pipelined
            pl.BlockSpec((G * F, G * H1), lambda i: (0, 0)),     # W1 block-diag (VMEM-resident)
            pl.BlockSpec((1, G * H1), lambda i: (0, 0)),         # b1 tiled
            pl.BlockSpec((G * H1, G * H2), lambda i: (0, 0)),    # W2 block-diag
            pl.BlockSpec((1, G * H2), lambda i: (0, 0)),         # b2 tiled
            pl.BlockSpec((G * H2, G), lambda i: (0, 0)),         # W3 block columns
            pl.BlockSpec(memory_space=pltpu.MemorySpace.SMEM),   # b3 scalar
        ],
        out_specs=pl.BlockSpec((tbp, G), lambda i: (i, 0)),
        compiler_params=pltpu.CompilerParams(
            dimension_semantics=("parallel",),                   # megacore split on v7x
            vmem_limit_bytes=32 * 1024 * 1024,
        ),
        cost_estimate=pl.CostEstimate(
            flops=flops, transcendentals=0, bytes_accessed=bytes_accessed),
    )(xp, w1bd, b1t, w2bd, b2t, w3bd, b3s)

    # (R, 8) row-major flatten == logical row order; slice off padded rows.
    return out_packed.reshape(b_pad, 1)[:B]


def init_params(key, input_size):
    """Deterministic parameter init (PyTorch-style uniform fan-in bounds)."""
    def linear(k, fan_in, fan_out):
        kw, kb = jax.random.split(k)
        bound = 1.0 / jnp.sqrt(float(fan_in))
        w = jax.random.uniform(kw, (fan_in, fan_out), jnp.float32, -bound, bound)
        b = jax.random.uniform(kb, (1, fan_out), jnp.float32, -bound, bound)
        return w, b

    k1, k2, k3 = jax.random.split(key, 3)
    w1, b1 = linear(k1, input_size, 64)
    w2, b2 = linear(k2, 64, 32)
    w3, b3 = linear(k3, 32, 1)
    return (w1, b1, w2, b2, w3, b3)


def reference_forward(x, params, precision=None):
    """Pure JAX reference (module semantics, eval mode)."""
    w1, b1, w2, b2, w3, b3 = params
    h1 = jnp.maximum(jnp.dot(x, w1, precision=precision) + b1, 0.0)
    h2 = jnp.maximum(jnp.dot(h1, w2, precision=precision) + b2, 0.0)
    return jnp.dot(h2, w3, precision=precision) + b3


if __name__ == "__main__":
    key = jax.random.PRNGKey(0)
    k_x, k_p = jax.random.split(key)

    input_size = 16  # number of feature columns after dropping the target
    params = init_params(k_p, input_size)
    hp = jax.lax.Precision.HIGHEST

    # 1) Tiny batch: single tile path.
    x_small = jax.random.normal(k_x, (8, input_size), dtype=jnp.float32)
    out_small = jax.block_until_ready(f1_predictor_forward(x_small, params))
    assert out_small.shape == (8, 1), out_small.shape
    assert jnp.allclose(out_small, reference_forward(x_small, params),
                        atol=2e-2, rtol=2e-2), "small batch: mismatch vs reference"
    assert jnp.allclose(out_small, reference_forward(x_small, params, precision=hp),
                        atol=5e-2, rtol=5e-2), "small batch: mismatch vs f32 reference"

    # 2) Medium batch (multiple of 8, single big tile).
    x_med = jax.random.normal(k_x, (1000, input_size), dtype=jnp.float32)
    out_med = jax.block_until_ready(f1_predictor_forward(x_med, params))
    assert out_med.shape == (1000, 1), out_med.shape
    assert jnp.allclose(out_med, reference_forward(x_med, params),
                        atol=2e-2, rtol=2e-2), "medium batch: mismatch vs reference"

    # 3) Larger, non-multiple-of-8 batch: exercises the <=7-row pad, the multi-tile grid
    #    and the ragged last block (undefined OOB rows are discarded / sliced off).
    x_big = jax.random.normal(k_x, (3001, input_size), dtype=jnp.float32)
    out_big = jax.block_until_ready(f1_predictor_forward(x_big, params))
    assert out_big.shape == (3001, 1), out_big.shape
    assert jnp.allclose(out_big, reference_forward(x_big, params),
                        atol=2e-2, rtol=2e-2), "big batch: mismatch vs reference"
    assert jnp.allclose(out_big, reference_forward(x_big, params, precision=hp),
                        atol=5e-2, rtol=5e-2), "big batch: mismatch vs f32 reference"

    print("KERNEL_OK")
</pallas_src>

<mosaic_0001>
module attributes {stable_mosaic.version = 11 : i64} {
  func.func @_mlp_kernel(%arg0: i32, %arg1: memref<8x128xf32, #tpu.memory_space<vmem>>, %arg2: memref<128x512xf32, #tpu.memory_space<vmem>>, %arg3: memref<1x512xf32, #tpu.memory_space<vmem>>, %arg4: memref<512x256xf32, #tpu.memory_space<vmem>>, %arg5: memref<1x256xf32, #tpu.memory_space<vmem>>, %arg6: memref<256x8xf32, #tpu.memory_space<vmem>>, %arg7: memref<1x1xf32, #tpu.memory_space<smem>>, %arg8: memref<8x8xf32, #tpu.memory_space<vmem>>) attributes {dimension_semantics = [#tpu.dimension_semantics<parallel>], iteration_bounds = array<i64: 1>, scalar_prefetch = 0 : i64, scratch_operands = 0 : i64, tpu.core_type = #tpu.core_type<tc>, window_params = [{transform_indices = @transform_0, window_bounds = array<i64: 8, 128>}, {pipeline_mode = #tpu.pipeline_mode<synchronous>, transform_indices = @transform_1, window_bounds = array<i64: 128, 512>}, {pipeline_mode = #tpu.pipeline_mode<synchronous>, transform_indices = @transform_2, window_bounds = array<i64: 1, 512>}, {pipeline_mode = #tpu.pipeline_mode<synchronous>, transform_indices = @transform_3, window_bounds = array<i64: 512, 256>}, {pipeline_mode = #tpu.pipeline_mode<synchronous>, transform_indices = @transform_4, window_bounds = array<i64: 1, 256>}, {pipeline_mode = #tpu.pipeline_mode<synchronous>, transform_indices = @transform_5, window_bounds = array<i64: 256, 8>}, {transform_indices = @transform_6, window_bounds = array<i64: 1, 1>}, {transform_indices = @transform_7, window_bounds = array<i64: 8, 8>}]} {
    %c0 = arith.constant 0 : index
    %c0_0 = arith.constant 0 : index
    %0 = vector.load %arg1[%c0, %c0_0] : memref<8x128xf32, #tpu.memory_space<vmem>>, vector<8x128xf32>
    %c0_1 = arith.constant 0 : index
    %c0_2 = arith.constant 0 : index
    %1 = vector.load %arg2[%c0_1, %c0_2] : memref<128x512xf32, #tpu.memory_space<vmem>>, vector<128x512xf32>
    %cst = arith.constant dense<0.000000e+00> : vector<8x512xf32>
    %2 = tpu.matmul %0, %1, %cst {dimension_numbers = #tpu.dot_dimension_numbers<[1], [0], [0], [1], [0, 0, 1, 1], [], []>} : vector<8x128xf32>, vector<128x512xf32>, vector<8x512xf32> -> vector<8x512xf32>
    %c0_3 = arith.constant 0 : index
    %c0_4 = arith.constant 0 : index
    %3 = vector.load %arg3[%c0_3, %c0_4] : memref<1x512xf32, #tpu.memory_space<vmem>>, vector<1x512xf32>
    %4 = vector.broadcast %3 : vector<1x512xf32> to vector<8x512xf32>
    %5 = arith.addf %2, %4 : vector<8x512xf32>
    %cst_5 = arith.constant 0.000000e+00 : f32
    %6 = vector.broadcast %cst_5 : f32 to vector<8x512xf32>
    %7 = arith.maximumf %5, %6 : vector<8x512xf32>
    %c0_6 = arith.constant 0 : index
    %c0_7 = arith.constant 0 : index
    %8 = vector.load %arg4[%c0_6, %c0_7] : memref<512x256xf32, #tpu.memory_space<vmem>>, vector<512x256xf32>
    %cst_8 = arith.constant dense<0.000000e+00> : vector<8x256xf32>
    %9 = tpu.matmul %7, %8, %cst_8 {dimension_numbers = #tpu.dot_dimension_numbers<[1], [0], [0], [1], [0, 0, 1, 1], [], []>} : vector<8x512xf32>, vector<512x256xf32>, vector<8x256xf32> -> vector<8x256xf32>
    %c0_9 = arith.constant 0 : index
    %c0_10 = arith.constant 0 : index
    %10 = vector.load %arg5[%c0_9, %c0_10] : memref<1x256xf32, #tpu.memory_space<vmem>>, vector<1x256xf32>
    %11 = vector.broadcast %10 : vector<1x256xf32> to vector<8x256xf32>
    %12 = arith.addf %9, %11 : vector<8x256xf32>
    %cst_11 = arith.constant 0.000000e+00 : f32
    %13 = vector.broadcast %cst_11 : f32 to vector<8x256xf32>
    %14 = arith.maximumf %12, %13 : vector<8x256xf32>
    %c0_12 = arith.constant 0 : index
    %c0_13 = arith.constant 0 : index
    %15 = vector.load %arg6[%c0_12, %c0_13] : memref<256x8xf32, #tpu.memory_space<vmem>>, vector<256x8xf32>
    %cst_14 = arith.constant dense<0.000000e+00> : vector<8x8xf32>
    %16 = tpu.matmul %14, %15, %cst_14 {dimension_numbers = #tpu.dot_dimension_numbers<[1], [0], [0], [1], [0, 0, 1, 1], [], []>} : vector<8x256xf32>, vector<256x8xf32>, vector<8x8xf32> -> vector<8x8xf32>
    %c0_15 = arith.constant 0 : index
    %c0_16 = arith.constant 0 : index
    %17 = memref.load %arg7[%c0_15, %c0_16] : memref<1x1xf32, #tpu.memory_space<smem>>
    %18 = vector.broadcast %17 : f32 to vector<8x8xf32>
    %19 = arith.addf %16, %18 : vector<8x8xf32>
    %c0_17 = arith.constant 0 : index
    %c0_18 = arith.constant 0 : index
    %20 = vector.load %arg8[%c0_17, %c0_18] : memref<8x8xf32, #tpu.memory_space<vmem>>, vector<8x8xf32>
    tpu.vector_store %arg8[%c0_17, %c0_18], %19 {strides = array<i32>} : memref<8x8xf32, #tpu.memory_space<vmem>>, vector<8x8xf32>,
    return
  }
  func.func @transform_0(%arg0: i32) -> (i32, i32) {
    %c0_i32 = arith.constant 0 : i32
    %c0_i32_0 = arith.constant 0 : i32
    return %arg0, %c0_i32 : i32, i32
  }
  func.func @transform_1(%arg0: i32) -> (i32, i32) {
    %c0_i32 = arith.constant 0 : i32
    %c0_i32_0 = arith.constant 0 : i32
    %c0_i32_1 = arith.constant 0 : i32
    return %c0_i32, %c0_i32_0 : i32, i32
  }
  func.func @transform_2(%arg0: i32) -> (i32, i32) {
    %c0_i32 = arith.constant 0 : i32
    %c0_i32_0 = arith.constant 0 : i32
    %c0_i32_1 = arith.constant 0 : i32
    return %c0_i32, %c0_i32_0 : i32, i32
  }
  func.func @transform_3(%arg0: i32) -> (i32, i32) {
    %c0_i32 = arith.constant 0 : i32
    %c0_i32_0 = arith.constant 0 : i32
    %c0_i32_1 = arith.constant 0 : i32
    return %c0_i32, %c0_i32_0 : i32, i32
  }
  func.func @transform_4(%arg0: i32) -> (i32, i32) {
    %c0_i32 = arith.constant 0 : i32
    %c0_i32_0 = arith.constant 0 : i32
    %c0_i32_1 = arith.constant 0 : i32
    return %c0_i32, %c0_i32_0 : i32, i32
  }
  func.func @transform_5(%arg0: i32) -> (i32, i32) {
    %c0_i32 = arith.constant 0 : i32
    %c0_i32_0 = arith.constant 0 : i32
    %c0_i32_1 = arith.constant 0 : i32
    return %c0_i32, %c0_i32_0 : i32, i32
  }
  func.func @transform_6(%arg0: i32) -> (i32, i32) {
    %c0_i32 = arith.constant 0 : i32
    %c0_i32_0 = arith.constant 0 : i32
    %c0_i32_1 = arith.constant 0 : i32
    return %c0_i32, %c0_i32_0 : i32, i32
  }
  func.func @transform_7(%arg0: i32) -> (i32, i32) {
    %c0_i32 = arith.constant 0 : i32
    %c0_i32_0 = arith.constant 0 : i32
    return %arg0, %c0_i32 : i32, i32
  }
}

</mosaic_0001>

<bundles_post_ra>
// kernel: tpu_custom_call.1
= control target key start
LH: loop header
LB: loop body
LE: loop exit
PB: predicated region body
PF: predicated region fallthrough
CT: control target
= control target key end

     0   :  { %13 = vsyncpa [#allocation4], 0  ;;  %s858_s0 = inlined_call_operand.vmem [shape: f32[8,128], index: 0, kind: input, shape index: {}]   ;;  %s859_s1 = inlined_call_operand.hbm [shape: f32[128,512], index: 1, kind: input, shape index: {}]   ;;  %s860_s2 = inlined_call_operand.vmem [shape: f32[1,512], index: 2, kind: input, shape index: {}]   ;;  %s861_s3 = inlined_call_operand.hbm [shape: f32[512,256], index: 3, kind: input, shape index: {}]   ;;  %s862_s4 = inlined_call_operand.vmem [shape: f32[1,256], index: 4, kind: input, shape index: {}]   ;;  %s863_s5 = inlined_call_operand.vmem [shape: f32[256,8], index: 5, kind: input, shape index: {}]   ;;  %s864_s6 = inlined_call_operand.<no memory space> [shape: f32[1,1], index: 6, kind: input, shape index: {}]   ;;  %s865_s7 = inlined_call_operand.hbm [shape: f32[8,8], index: 7, kind: output, shape index: {}]  }
   0x1   :  { %14 = vsyncpa [#allocation7], 0 }
   0x2   :  { %15 = vsyncpa [#allocation5], 0  ;;  %s22_s26 = sshll.u32 %s859_s1, 4  ;;  %s694_s27 = smov [#allocation3]   ;;  %s23_s26 = int_to_ptr.hbm [resolvable:$true] %s22_s26 }
   0x3   :  { %s24_s28 = sshll.u32 %s694_s27, 4  ;;  %s37_s8 = sshll.u32 %s861_s3, 4  ;;  %s25_s28 = int_to_ptr.vmem [resolvable:$true] %s24_s28  ;;  %s38_s8 = int_to_ptr.hbm [resolvable:$true] %s37_s8 }
   0x4   :  { %s695_s9 = smov 512   ;;  %s696_s10 = smov 32  }
   0x5   :  { %30 = dma.hbm_to_vmem [thread:$0]  %s23_s26, 8192, %s25_s28, [#allocation4], %s695_s9, %s695_s9, %s696_s10  }
   0x6   :  { %s697_s11 = smov [#allocation6]   ;;  %s698_s13 = smov 256  }
   0x7   :  { %s39_s12 = sshll.u32 %s697_s11, 4  ;;  %s699_s14 = smov 16   ;;  %s40_s12 = int_to_ptr.vmem [resolvable:$true] %s39_s12 }
   0x8   :  { %45 = dma.hbm_to_vmem [thread:$0]  %s38_s8, 16384, %s40_s12, [#allocation7], %s698_s13, %s698_s13, %s699_s14  }
   0x9   :  { %688 = dma.done.wait [#allocation4], 8192  }
   0xa   :  { %689 = vsyncadd [#allocation4], 4294959104 }
   0xb   :  { %690 = dma.done.wait [#allocation7], 16384  }
   0xc   :  { %691 = vsyncadd [#allocation7], 4294950912  ;;  %v121_v0 = vld [vmem:[#allocation3 + $0x1e0] sm:$0xff]  ;;  %v123_v1 = vld [vmem:[#allocation3 + $0x1f0] sm:$0xff]  ;;  %s700_s27 = smov [#allocation8]   ;;  %s598_s8 = sshll.u32 %s865_s7, 4  ;;  %s599_s8 = int_to_ptr.hbm [resolvable:$true] %s598_s8 }
   0xd   :  { %v124_v2 = vld [vmem:[#allocation3 + $0x1f8] sm:$0xff]  ;;  %135 = vmatpush.msra.mxu0 %v121_v0  ;;  %175 = vmatpush.msra.mxu2 %v123_v1  ;;  %v117_v3 = vld [vmem:[#allocation3 + $0x1c0] sm:$0xff]  ;;  %v122_v4 = vld [vmem:[#allocation3 + $0x1e8] sm:$0xff]  ;;  %s596_s28 = sshll.u32 %s700_s27, 4  ;;  %vm589_vm0 = vcmask 64512   ;;  %s597_s28 = int_to_ptr.vmem [resolvable:$true] %s596_s28 }
   0xe   :  { %v119_v5 = vld [vmem:[#allocation3 + $0x1d0] sm:$0xff]  ;;  %195 = vmatpush.msra.mxu3 %v124_v2  ;;  %155 = vmatpush.msra.mxu1 %v122_v4  ;;  %v120_v6 = vld [vmem:[#allocation3 + $0x1d8] sm:$0xff]  ;;  %v113_v7 = vld [vmem:[#allocation3 + $0x1a0] sm:$0xff] }
   0xf   :  { %v118_v8 = vld [vmem:[#allocation3 + $0x1c8] sm:$0xff]  ;;  %136 = vmatpush.msra.mxu0 %v117_v3  ;;  %176 = vmatpush.msra.mxu2 %v119_v5  ;;  %v115_v9 = vld [vmem:[#allocation3 + $0x1b0] sm:$0xff]  ;;  %v116_v10 = vld [vmem:[#allocation3 + $0x1b8] sm:$0xff] }
  0x10   :  { %196 = vmatpush.msra.mxu3 %v120_v6  ;;  %156 = vmatpush.msra.mxu1 %v118_v8  ;;  %v109_v11 = vld [vmem:[#allocation3 + $0x180] sm:$0xff]  ;;  %v114_v12 = vld [vmem:[#allocation3 + $0x1a8] sm:$0xff]  ;;  %v111_v13 = vld [vmem:[#allocation3 + $0x190] sm:$0xff] }
  0x11   :  { %137 = vmatpush.msra.mxu0 %v113_v7  ;;  %177 = vmatpush.msra.mxu2 %v115_v9  ;;  %v112_v14 = vld [vmem:[#allocation3 + $0x198] sm:$0xff]  ;;  %v110_v15 = vld [vmem:[#allocation3 + $0x188] sm:$0xff]  ;;  %v105_v16 = vld [vmem:[#allocation3 + $0x160] sm:$0xff] }
  0x12   :  { %197 = vmatpush.msra.mxu3 %v116_v10  ;;  %157 = vmatpush.msra.mxu1 %v114_v12  ;;  %v107_v17 = vld [vmem:[#allocation3 + $0x170] sm:$0xff]  ;;  %v108_v18 = vld [vmem:[#allocation3 + $0x178] sm:$0xff]  ;;  %v106_v19 = vld [vmem:[#allocation3 + $0x168] sm:$0xff] }
  0x13   :  { %138 = vmatpush.msra.mxu0 %v109_v11  ;;  %178 = vmatpush.msra.mxu2 %v111_v13  ;;  %v101_v20 = vld [vmem:[#allocation3 + $0x140] sm:$0xff]  ;;  %v103_v21 = vld [vmem:[#allocation3 + $0x150] sm:$0xff]  ;;  %v104_v22 = vld [vmem:[#allocation3 + $0x158] sm:$0xff] }
  0x14   :  { %198 = vmatpush.msra.mxu3 %v112_v14  ;;  %158 = vmatpush.msra.mxu1 %v110_v15  ;;  %v102_v23 = vld [vmem:[#allocation3 + $0x148] sm:$0xff]  ;;  %v97_v24 = vld [vmem:[#allocation3 + $0x120] sm:$0xff]  ;;  %v99_v25 = vld [vmem:[#allocation3 + $0x130] sm:$0xff] }
  0x15   :  { %139 = vmatpush.msra.mxu0 %v105_v16  ;;  %179 = vmatpush.msra.mxu2 %v107_v17  ;;  %v100_v26 = vld [vmem:[#allocation3 + $0x138] sm:$0xff]  ;;  %v98_v27 = vld [vmem:[#allocation3 + $0x128] sm:$0xff]  ;;  %v93_v28 = vld [vmem:[#allocation3 + $0x100] sm:$0xff] }
  0x16   :  { %199 = vmatpush.msra.mxu3 %v108_v18  ;;  %159 = vmatpush.msra.mxu1 %v106_v19  ;;  %v95_v29 = vld [vmem:[#allocation3 + $0x110] sm:$0xff]  ;;  %v96_v30 = vld [vmem:[#allocation3 + $0x118] sm:$0xff]  ;;  %v94_v31 = vld [vmem:[#allocation3 + $0x108] sm:$0xff] }
  0x17   :  { %140 = vmatpush.msra.mxu0 %v101_v20  ;;  %180 = vmatpush.msra.mxu2 %v103_v21  ;;  %v89_v32 = vld [vmem:[#allocation3 + $0xe0] sm:$0xff]  ;;  %v91_v33 = vld [vmem:[#allocation3 + $0xf0] sm:$0xff]  ;;  %v92_v34 = vld [vmem:[#allocation3 + $0xf8] sm:$0xff] }
  0x18   :  { %200 = vmatpush.msra.mxu3 %v104_v22  ;;  %160 = vmatpush.msra.mxu1 %v102_v23  ;;  %v90_v35 = vld [vmem:[#allocation3 + $0xe8] sm:$0xff]  ;;  %v85_v36 = vld [vmem:[#allocation3 + $0xc0] sm:$0xff]  ;;  %v87_v37 = vld [vmem:[#allocation3 + $0xd0] sm:$0xff] }
  0x19   :  { %141 = vmatpush.msra.mxu0 %v97_v24  ;;  %181 = vmatpush.msra.mxu2 %v99_v25  ;;  %v88_v38 = vld [vmem:[#allocation3 + $0xd8] sm:$0xff]  ;;  %v86_v39 = vld [vmem:[#allocation3 + $0xc8] sm:$0xff]  ;;  %v81_v40 = vld [vmem:[#allocation3 + $0xa0] sm:$0xff] }
  0x1a   :  { %201 = vmatpush.msra.mxu3 %v100_v26  ;;  %161 = vmatpush.msra.mxu1 %v98_v27  ;;  %v83_v41 = vld [vmem:[#allocation3 + $0xb0] sm:$0xff]  ;;  %v84_v42 = vld [vmem:[#allocation3 + $0xb8] sm:$0xff]  ;;  %v82_v43 = vld [vmem:[#allocation3 + $0xa8] sm:$0xff] }
  0x1b   :  { %142 = vmatpush.msra.mxu0 %v93_v28  ;;  %182 = vmatpush.msra.mxu2 %v95_v29  ;;  %v77_v44 = vld [vmem:[#allocation3 + $0x80] sm:$0xff]  ;;  %v79_v45 = vld [vmem:[#allocation3 + $0x90] sm:$0xff]  ;;  %v80_v46 = vld [vmem:[#allocation3 + $0x98] sm:$0xff] }
  0x1c   :  { %202 = vmatpush.msra.mxu3 %v96_v30  ;;  %162 = vmatpush.msra.mxu1 %v94_v31  ;;  %v78_v47 = vld [vmem:[#allocation3 + $0x88] sm:$0xff]  ;;  %v73_v48 = vld [vmem:[#allocation3 + $0x60] sm:$0xff]  ;;  %v75_v49 = vld [vmem:[#allocation3 + $0x70] sm:$0xff] }
  0x1d   :  { %143 = vmatpush.msra.mxu0 %v89_v32  ;;  %183 = vmatpush.msra.mxu2 %v91_v33  ;;  %v76_v50 = vld [vmem:[#allocation3 + $0x78] sm:$0xff]  ;;  %v74_v51 = vld [vmem:[#allocation3 + $0x68] sm:$0xff]  ;;  %v69_v52 = vld [vmem:[#allocation3 + $0x40] sm:$0xff] }
  0x1e   :  { %203 = vmatpush.msra.mxu3 %v92_v34  ;;  %163 = vmatpush.msra.mxu1 %v90_v35  ;;  %v71_v53 = vld [vmem:[#allocation3 + $0x50] sm:$0xff]  ;;  %v72_v54 = vld [vmem:[#allocation3 + $0x58] sm:$0xff]  ;;  %v70_v55 = vld [vmem:[#allocation3 + $0x48] sm:$0xff] }
  0x1f   :  { %144 = vmatpush.msra.mxu0 %v85_v36  ;;  %184 = vmatpush.msra.mxu2 %v87_v37  ;;  %v65_v56 = vld [vmem:[#allocation3 + $0x20] sm:$0xff]  ;;  %v67_v57 = vld [vmem:[#allocation3 + $0x30] sm:$0xff]  ;;  %v68_v58 = vld [vmem:[#allocation3 + $0x38] sm:$0xff] }
  0x20   :  { %204 = vmatpush.msra.mxu3 %v88_v38  ;;  %164 = vmatpush.msra.mxu1 %v86_v39  ;;  %v66_v59 = vld [vmem:[#allocation3 + $0x28] sm:$0xff]  ;;  %v61_v60 = vld [vmem:[#allocation3] sm:$0xff]  ;;  %v63_v61 = vld [vmem:[#allocation3 + $0x10] sm:$0xff] }
  0x21   :  { %145 = vmatpush.msra.mxu0 %v81_v40  ;;  %185 = vmatpush.msra.mxu2 %v83_v41  ;;  %v64_v62 = vld [vmem:[#allocation3 + $0x18] sm:$0xff]  ;;  %v60_v63 = vld [vmem:[%s858_s0] sm:$0xff]  ;;  %v62_v0 = vld [vmem:[#allocation3 + $0x8] sm:$0xff] }
  0x22   :  { %205 = vmatpush.msra.mxu3 %v84_v42  ;;  %165 = vmatpush.msra.mxu1 %v82_v43  ;;  %v249_v1 = vld [vmem:[#allocation6 + $0xf0] sm:$0xff]  ;;  %v247_v3 = vld [vmem:[#allocation6 + $0xe0] sm:$0xff] }
  0x23   :  { %146 = vmatpush.msra.mxu0 %v77_v44  ;;  %186 = vmatpush.msra.mxu2 %v79_v45  ;;  %v313_v2 = vld [vmem:[#allocation6 + $0x2f0] sm:$0xff]  ;;  %v311_v6 = vld [vmem:[#allocation6 + $0x2e0] sm:$0xff] }
  0x24   :  { %206 = vmatpush.msra.mxu3 %v80_v46  ;;  %166 = vmatpush.msra.mxu1 %v78_v47  ;;  %v281_v4 = vld [vmem:[#allocation6 + $0x1f0] sm:$0xff]  ;;  %v279_v8 = vld [vmem:[#allocation6 + $0x1e0] sm:$0xff] }
  0x25   :  { %147 = vmatpush.msra.mxu0 %v73_v48  ;;  %187 = vmatpush.msra.mxu2 %v75_v49  ;;  %v345_v5 = vld [vmem:[#allocation6 + $0x3f0] sm:$0xff]  ;;  %v343_v9 = vld [vmem:[#allocation6 + $0x3e0] sm:$0xff] }
  0x26   :  { %207 = vmatpush.msra.mxu3 %v76_v50  ;;  %167 = vmatpush.msra.mxu1 %v74_v51  ;;  %v245_v7 = vld [vmem:[#allocation6 + $0xd0] sm:$0xff]  ;;  %v243_v11 = vld [vmem:[#allocation6 + $0xc0] sm:$0xff] }
  0x27   :  { %148 = vmatpush.msra.mxu0 %v69_v52  ;;  %188 = vmatpush.msra.mxu2 %v71_v53  ;;  %v309_v10 = vld [vmem:[#allocation6 + $0x2d0] sm:$0xff]  ;;  %v307_v14 = vld [vmem:[#allocation6 + $0x2c0] sm:$0xff] }
  0x28   :  { %208 = vmatpush.msra.mxu3 %v72_v54  ;;  %168 = vmatpush.msra.mxu1 %v70_v55  ;;  %v277_v12 = vld [vmem:[#allocation6 + $0x1d0] sm:$0xff]  ;;  %v275_v16 = vld [vmem:[#allocation6 + $0x1c0] sm:$0xff] }
  0x29   :  { %149 = vmatpush.msra.mxu0 %v65_v56  ;;  %189 = vmatpush.msra.mxu2 %v67_v57  ;;  %v341_v13 = vld [vmem:[#allocation6 + $0x3d0] sm:$0xff]  ;;  %v339_v17 = vld [vmem:[#allocation6 + $0x3c0] sm:$0xff] }
  0x2a   :  { %209 = vmatpush.msra.mxu3 %v68_v58  ;;  %169 = vmatpush.msra.mxu1 %v66_v59  ;;  %v241_v15 = vld [vmem:[#allocation6 + $0xb0] sm:$0xff]  ;;  %v239_v19 = vld [vmem:[#allocation6 + $0xa0] sm:$0xff] }
  0x2b   :  { %150 = vmatpush.msra.mxu0 %v61_v60  ;;  %190 = vmatpush.msra.mxu2 %v63_v61  ;;  %v305_v18 = vld [vmem:[#allocation6 + $0x2b0] sm:$0xff]  ;;  %v303_v22 = vld [vmem:[#allocation6 + $0x2a0] sm:$0xff]  ;;  %v250_v61 = vld [vmem:[#allocation6 + $0xf8] sm:$0xff] }
  0x2c   :  { %210 = vmatpush.msra.mxu3 %v64_v62  ;;  %151 = vmatmul.f32.vlgmr.msra.gmra.mxu0 %v60_v63  ;;  %v273_v20 = vld [vmem:[#allocation6 + $0x1b0] sm:$0xff]  ;;  %v271_v24 = vld [vmem:[#allocation6 + $0x1a0] sm:$0xff] }
  0x2d   :  { %191 = vmatmul.f32.vlgmr.msra.gmra.mxu2 %v60_v63  ;;  %211 = vmatmul.f32.vlgmr.msra.gmra.mxu3 %v60_v63  ;;  %v337_v21 = vld [vmem:[#allocation6 + $0x3b0] sm:$0xff]  ;;  %v335_v25 = vld [vmem:[#allocation6 + $0x3a0] sm:$0xff] }
  0x2e   :  { %170 = vmatpush.msra.mxu1 %v62_v0  ;;  %353 = vmatpush.msrb.mxu0 %v249_v1  ;;  %v237_v23 = vld [vmem:[#allocation6 + $0x90] sm:$0xff]  ;;  %v235_v27 = vld [vmem:[#allocation6 + $0x80] sm:$0xff]  ;;  %v248_v1 = vld [vmem:[#allocation6 + $0xe8] sm:$0xff] }
  0x2f   :  { %171 = vmatmul.f32.vlgmr.msra.gmra.mxu1 %v60_v63  ;;  %393 = vmatpush.msrb.mxu2 %v313_v2  ;;  %v301_v26 = vld [vmem:[#allocation6 + $0x290] sm:$0xff]  ;;  %v299_v30 = vld [vmem:[#allocation6 + $0x280] sm:$0xff]  ;;  %v282_v2 = vld [vmem:[#allocation6 + $0x1f8] sm:$0xff] }
  0x30   :  { %354 = vmatpush.msrb.mxu0 %v247_v3  ;;  %373 = vmatpush.msrb.mxu1 %v281_v4  ;;  %v269_v28 = vld [vmem:[#allocation6 + $0x190] sm:$0xff]  ;;  %v267_v32 = vld [vmem:[#allocation6 + $0x180] sm:$0xff]  ;;  %v314_v4 = vld [vmem:[#allocation6 + $0x2f8] sm:$0xff] }
  0x31   :  { %413 = vmatpush.msrb.mxu3 %v345_v5  ;;  %394 = vmatpush.msrb.mxu2 %v311_v6  ;;  %v333_v29 = vld [vmem:[#allocation6 + $0x390] sm:$0xff]  ;;  %v331_v33 = vld [vmem:[#allocation6 + $0x380] sm:$0xff]  ;;  %v246_v5 = vld [vmem:[#allocation6 + $0xd8] sm:$0xff] }
  0x32   :  { %355 = vmatpush.msrb.mxu0 %v245_v7  ;;  %374 = vmatpush.msrb.mxu1 %v279_v8  ;;  %v233_v31 = vld [vmem:[#allocation6 + $0x70] sm:$0xff]  ;;  %v231_v35 = vld [vmem:[#allocation6 + $0x60] sm:$0xff]  ;;  %v280_v6 = vld [vmem:[#allocation6 + $0x1e8] sm:$0xff] }
  0x33   :  { %414 = vmatpush.msrb.mxu3 %v343_v9  ;;  %395 = vmatpush.msrb.mxu2 %v309_v10  ;;  %v297_v34 = vld [vmem:[#allocation6 + $0x270] sm:$0xff]  ;;  %v295_v38 = vld [vmem:[#allocation6 + $0x260] sm:$0xff]  ;;  %v346_v7 = vld [vmem:[#allocation6 + $0x3f8] sm:$0xff] }
  0x34   :  { %356 = vmatpush.msrb.mxu0 %v243_v11  ;;  %375 = vmatpush.msrb.mxu1 %v277_v12  ;;  %v265_v36 = vld [vmem:[#allocation6 + $0x170] sm:$0xff]  ;;  %v263_v40 = vld [vmem:[#allocation6 + $0x160] sm:$0xff]  ;;  %v312_v8 = vld [vmem:[#allocation6 + $0x2e8] sm:$0xff] }
  0x35   :  { %415 = vmatpush.msrb.mxu3 %v341_v13  ;;  %396 = vmatpush.msrb.mxu2 %v307_v14  ;;  %v329_v37 = vld [vmem:[#allocation6 + $0x370] sm:$0xff]  ;;  %v327_v41 = vld [vmem:[#allocation6 + $0x360] sm:$0xff]  ;;  %v244_v9 = vld [vmem:[#allocation6 + $0xc8] sm:$0xff] }
  0x36   :  { %357 = vmatpush.msrb.mxu0 %v241_v15  ;;  %376 = vmatpush.msrb.mxu1 %v275_v16  ;;  %v229_v39 = vld [vmem:[#allocation6 + $0x50] sm:$0xff]  ;;  %v227_v43 = vld [vmem:[#allocation6 + $0x40] sm:$0xff]  ;;  %v278_v10 = vld [vmem:[#allocation6 + $0x1d8] sm:$0xff] }
  0x37   :  { %416 = vmatpush.msrb.mxu3 %v339_v17  ;;  %397 = vmatpush.msrb.mxu2 %v305_v18  ;;  %v293_v42 = vld [vmem:[#allocation6 + $0x250] sm:$0xff]  ;;  %v291_v46 = vld [vmem:[#allocation6 + $0x240] sm:$0xff]  ;;  %v344_v11 = vld [vmem:[#allocation6 + $0x3e8] sm:$0xff] }
  0x38   :  { %358 = vmatpush.msrb.mxu0 %v239_v19  ;;  %377 = vmatpush.msrb.mxu1 %v273_v20  ;;  %v261_v44 = vld [vmem:[#allocation6 + $0x150] sm:$0xff]  ;;  %v259_v48 = vld [vmem:[#allocation6 + $0x140] sm:$0xff]  ;;  %v310_v12 = vld [vmem:[#allocation6 + $0x2d8] sm:$0xff] }
  0x39   :  { %417 = vmatpush.msrb.mxu3 %v337_v21  ;;  %398 = vmatpush.msrb.mxu2 %v303_v22  ;;  %v325_v45 = vld [vmem:[#allocation6 + $0x350] sm:$0xff]  ;;  %v323_v49 = vld [vmem:[#allocation6 + $0x340] sm:$0xff]  ;;  %v242_v13 = vld [vmem:[#allocation6 + $0xb8] sm:$0xff] }
  0x3a   :  { %359 = vmatpush.msrb.mxu0 %v237_v23  ;;  %378 = vmatpush.msrb.mxu1 %v271_v24  ;;  %v225_v47 = vld [vmem:[#allocation6 + $0x30] sm:$0xff]  ;;  %v223_v51 = vld [vmem:[#allocation6 + $0x20] sm:$0xff]  ;;  %v276_v14 = vld [vmem:[#allocation6 + $0x1c8] sm:$0xff] }
  0x3b   :  { %418 = vmatpush.msrb.mxu3 %v335_v25  ;;  %399 = vmatpush.msrb.mxu2 %v301_v26  ;;  %v289_v50 = vld [vmem:[#allocation6 + $0x230] sm:$0xff]  ;;  %v287_v54 = vld [vmem:[#allocation6 + $0x220] sm:$0xff]  ;;  %v342_v15 = vld [vmem:[#allocation6 + $0x3d8] sm:$0xff] }
  0x3c   :  { %360 = vmatpush.msrb.mxu0 %v235_v27  ;;  %379 = vmatpush.msrb.mxu1 %v269_v28  ;;  %v257_v52 = vld [vmem:[#allocation6 + $0x130] sm:$0xff]  ;;  %v255_v56 = vld [vmem:[#allocation6 + $0x120] sm:$0xff]  ;;  %v308_v16 = vld [vmem:[#allocation6 + $0x2c8] sm:$0xff] }
  0x3d   :  { %419 = vmatpush.msrb.mxu3 %v333_v29  ;;  %400 = vmatpush.msrb.mxu2 %v299_v30  ;;  %v321_v53 = vld [vmem:[#allocation6 + $0x330] sm:$0xff]  ;;  %v319_v57 = vld [vmem:[#allocation6 + $0x320] sm:$0xff]  ;;  %v240_v17 = vld [vmem:[#allocation6 + $0xa8] sm:$0xff] }
  0x3e   :  { %361 = vmatpush.msrb.mxu0 %v233_v31  ;;  %380 = vmatpush.msrb.mxu1 %v267_v32  ;;  %v221_v55 = vld [vmem:[#allocation6 + $0x10] sm:$0xff]  ;;  %v219_v59 = vld [vmem:[#allocation6] sm:$0xff]  ;;  %v274_v18 = vld [vmem:[#allocation6 + $0x1b8] sm:$0xff] }
  0x3f   :  { %420 = vmatpush.msrb.mxu3 %v331_v33  ;;  %401 = vmatpush.msrb.mxu2 %v297_v34  ;;  %v285_v58 = vld [vmem:[#allocation6 + $0x210] sm:$0xff]  ;;  %v251_v63 = vld [vmem:[#allocation6 + $0x100] sm:$0xff]  ;;  %v340_v19 = vld [vmem:[#allocation6 + $0x3c8] sm:$0xff] }
  0x40   :  { %362 = vmatpush.msrb.mxu0 %v231_v35  ;;  %381 = vmatpush.msrb.mxu1 %v265_v36  ;;  %v253_v60 = vld [vmem:[#allocation6 + $0x110] sm:$0xff]  ;;  %v283_v0 = vld [vmem:[#allocation6 + $0x200] sm:$0xff]  ;;  %v306_v20 = vld [vmem:[#allocation6 + $0x2b8] sm:$0xff] }
  0x41   :  { %421 = vmatpush.msrb.mxu3 %v329_v37  ;;  %402 = vmatpush.msrb.mxu2 %v295_v38  ;;  %v317_v62 = vld [vmem:[#allocation6 + $0x310] sm:$0xff]  ;;  %v315_v3 = vld [vmem:[#allocation6 + $0x300] sm:$0xff]  ;;  %v238_v21 = vld [vmem:[#allocation6 + $0x98] sm:$0xff] }
  0x42   :  { %363 = vmatpush.msrb.mxu0 %v229_v39  ;;  %382 = vmatpush.msrb.mxu1 %v263_v40  ;;  %v272_v22 = vld [vmem:[#allocation6 + $0x1a8] sm:$0xff]  ;;  %v338_v23 = vld [vmem:[#allocation6 + $0x3b8] sm:$0xff] }
  0x43   :  { %422 = vmatpush.msrb.mxu3 %v327_v41  ;;  %403 = vmatpush.msrb.mxu2 %v293_v42  ;;  %v304_v24 = vld [vmem:[#allocation6 + $0x2a8] sm:$0xff]  ;;  %v270_v26 = vld [vmem:[#allocation6 + $0x198] sm:$0xff] }
  0x44   :  { %364 = vmatpush.msrb.mxu0 %v227_v43  ;;  %383 = vmatpush.msrb.mxu1 %v261_v44  ;;  %v236_v25 = vld [vmem:[#allocation6 + $0x88] sm:$0xff]  ;;  %v234_v28 = vld [vmem:[#allocation6 + $0x78] sm:$0xff] }
  0x45   :  { %423 = vmatpush.msrb.mxu3 %v325_v45  ;;  %404 = vmatpush.msrb.mxu2 %v291_v46  ;;  %v336_v27 = vld [vmem:[#allocation6 + $0x3a8] sm:$0xff]  ;;  %v266_v31 = vld [vmem:[#allocation6 + $0x178] sm:$0xff] }
  0x46   :  { %365 = vmatpush.msrb.mxu0 %v225_v47  ;;  %384 = vmatpush.msrb.mxu1 %v259_v48  ;;  %v268_v29 = vld [vmem:[#allocation6 + $0x188] sm:$0xff]  ;;  %v302_v32 = vld [vmem:[#allocation6 + $0x298] sm:$0xff] }
  0x47   :  { %424 = vmatpush.msrb.mxu3 %v323_v49  ;;  %405 = vmatpush.msrb.mxu2 %v289_v50  ;;  %v232_v30 = vld [vmem:[#allocation6 + $0x68] sm:$0xff]  ;;  %v334_v33 = vld [vmem:[#allocation6 + $0x398] sm:$0xff] }
  0x48   :  { %366 = vmatpush.msrb.mxu0 %v223_v51  ;;  %385 = vmatpush.msrb.mxu1 %v257_v52  ;;  %v230_v34 = vld [vmem:[#allocation6 + $0x58] sm:$0xff]  ;;  %v264_v35 = vld [vmem:[#allocation6 + $0x168] sm:$0xff] }
  0x49   :  { %425 = vmatpush.msrb.mxu3 %v321_v53  ;;  %406 = vmatpush.msrb.mxu2 %v287_v54  ;;  %v300_v36 = vld [vmem:[#allocation6 + $0x288] sm:$0xff]  ;;  %v262_v39 = vld [vmem:[#allocation6 + $0x158] sm:$0xff] }
  0x4a   :  { %367 = vmatpush.msrb.mxu0 %v221_v55  ;;  %386 = vmatpush.msrb.mxu1 %v255_v56  ;;  %v332_v37 = vld [vmem:[#allocation6 + $0x388] sm:$0xff]  ;;  %v298_v40 = vld [vmem:[#allocation6 + $0x278] sm:$0xff] }
  0x4b   :  { %426 = vmatpush.msrb.mxu3 %v319_v57  ;;  %407 = vmatpush.msrb.mxu2 %v285_v58  ;;  %v228_v38 = vld [vmem:[#allocation6 + $0x48] sm:$0xff]  ;;  %v330_v41 = vld [vmem:[#allocation6 + $0x378] sm:$0xff] }
  0x4c   :  { %368 = vmatpush.msrb.mxu0 %v219_v59  ;;  %387 = vmatpush.msrb.mxu1 %v253_v60  ;;  %v226_v42 = vld [vmem:[#allocation6 + $0x38] sm:$0xff]  ;;  %v260_v43 = vld [vmem:[#allocation6 + $0x148] sm:$0xff] }
  0x4d   :  { %427 = vmatpush.msrb.mxu3 %v317_v62  ;;  %408 = vmatpush.msrb.mxu2 %v283_v0  ;;  %v296_v44 = vld [vmem:[#allocation6 + $0x268] sm:$0xff]  ;;  %v258_v47 = vld [vmem:[#allocation6 + $0x138] sm:$0xff] }
  0x4e   :  { %433 = vmatpush.msra.mxu0 %v250_v61  ;;  %388 = vmatpush.msrb.mxu1 %v251_v63  ;;  %v328_v45 = vld [vmem:[#allocation6 + $0x368] sm:$0xff]  ;;  %v294_v48 = vld [vmem:[#allocation6 + $0x258] sm:$0xff] }
  0x4f   :  { %428 = vmatpush.msrb.mxu3 %v315_v3  ;;  %473 = vmatpush.msra.mxu2 %v314_v4  ;;  %v224_v46 = vld [vmem:[#allocation6 + $0x28] sm:$0xff]  ;;  %v326_v49 = vld [vmem:[#allocation6 + $0x358] sm:$0xff] }
  0x50   :  { %434 = vmatpush.msra.mxu0 %v248_v1  ;;  %453 = vmatpush.msra.mxu1 %v282_v2  ;;  %v222_v50 = vld [vmem:[#allocation6 + $0x18] sm:$0xff]  ;;  %v256_v51 = vld [vmem:[#allocation6 + $0x128] sm:$0xff]  ;;  %v125_v1 = vld [vmem:[%s860_s2] sm:$0xf] }
  0x51   :  { %493 = vmatpush.msra.mxu3 %v346_v7  ;;  %474 = vmatpush.msra.mxu2 %v312_v8  ;;  %v292_v52 = vld [vmem:[#allocation6 + $0x248] sm:$0xff]  ;;  %v254_v55 = vld [vmem:[#allocation6 + $0x118] sm:$0xff]  ;;  %v127_v2 = vperm.slane %v125_v1, 0  ;;  %v128_v4 = vperm.slane %v125_v1, 1 }
  0x52   :  { %435 = vmatpush.msra.mxu0 %v246_v5  ;;  %454 = vmatpush.msra.mxu1 %v280_v6  ;;  %v324_v53 = vld [vmem:[#allocation6 + $0x348] sm:$0xff]  ;;  %v290_v56 = vld [vmem:[#allocation6 + $0x238] sm:$0xff] }
  0x53   :  { %494 = vmatpush.msra.mxu3 %v344_v11  ;;  %475 = vmatpush.msra.mxu2 %v310_v12  ;;  %v220_v54 = vld [vmem:[#allocation6 + $0x8] sm:$0xff]  ;;  %v322_v57 = vld [vmem:[#allocation6 + $0x338] sm:$0xff]  ;;  %v130_v11 = vperm.slane %v125_v1, 3  ;;  %v529_v12 = vld [vmem:[%s863_s5 + $0x70] sm:$0xff] }
  0x54   :  { %436 = vmatpush.msra.mxu0 %v244_v9  ;;  %455 = vmatpush.msra.mxu1 %v278_v10  ;;  %v252_v58 = vld [vmem:[#allocation6 + $0x108] sm:$0xff]  ;;  %v286_v61 = vld [vmem:[#allocation6 + $0x218] sm:$0xff]  ;;  %v129_v10 = vperm.slane %v125_v1, 2 }
  0x55   :  { %495 = vmatpush.msra.mxu3 %v342_v15  ;;  %476 = vmatpush.msra.mxu2 %v308_v16  ;;  %v288_v59 = vld [vmem:[#allocation6 + $0x228] sm:$0xff]  ;;  %v318_v62 = vld [vmem:[#allocation6 + $0x318] sm:$0xff] }
  0x56   :  { %437 = vmatpush.msra.mxu0 %v242_v13  ;;  %456 = vmatpush.msra.mxu1 %v276_v14  ;;  %v320_v60 = vld [vmem:[#allocation6 + $0x328] sm:$0xff]  ;;  %v530_v8 = vld [vmem:[%s863_s5 + $0x78] sm:$0xff] }
  0x57   :  { %496 = vmatpush.msra.mxu3 %v340_v19  ;;  %477 = vmatpush.msra.mxu2 %v306_v20  ;;  %v284_v63 = vld [vmem:[#allocation6 + $0x208] sm:$0xff]  ;;  %v546_v14 = vld [vmem:[%s863_s5 + $0xf8] sm:$0xff]  ;;  %v545_v20 = vld [vmem:[%s863_s5 + $0xf0] sm:$0xff] }
  0x58   :  { %438 = vmatpush.msra.mxu0 %v240_v17  ;;  %457 = vmatpush.msra.mxu1 %v274_v18  ;;  %v316_v0 = vld [vmem:[#allocation6 + $0x308] sm:$0xff] }
  0x59   :  { %497 = vmatpush.msra.mxu3 %v338_v23  ;;  %478 = vmatpush.msra.mxu2 %v304_v24  ;;  %v528_v17 = vld [vmem:[%s863_s5 + $0x68] sm:$0xff]  ;;  %v527_v23 = vld [vmem:[%s863_s5 + $0x60] sm:$0xff]  ;;  %v526_v24 = vld [vmem:[%s863_s5 + $0x58] sm:$0xff] }
  0x5a   :  { %439 = vmatpush.msra.mxu0 %v238_v21  ;;  %458 = vmatpush.msra.mxu1 %v272_v22 }
  0x5b   :  { %498 = vmatpush.msra.mxu3 %v336_v27  ;;  %479 = vmatpush.msra.mxu2 %v302_v32  ;;  %v544_v27 = vld [vmem:[%s863_s5 + $0xe8] sm:$0xff]  ;;  %v521_v32 = vld [vmem:[%s863_s5 + $0x30] sm:$0xff] }
  0x5c   :  { %440 = vmatpush.msra.mxu0 %v236_v25  ;;  %459 = vmatpush.msra.mxu1 %v270_v26  ;;  %v525_v25 = vld [vmem:[%s863_s5 + $0x50] sm:$0xff]  ;;  %v524_v26 = vld [vmem:[%s863_s5 + $0x48] sm:$0xff] }
  0x5d   :  { %499 = vmatpush.msra.mxu3 %v334_v33  ;;  %480 = vmatpush.msra.mxu2 %v300_v36  ;;  %v541_v33 = vld [vmem:[%s863_s5 + $0xd0] sm:$0xff]  ;;  %v519_v36 = vld [vmem:[%s863_s5 + $0x20] sm:$0xff] }
  0x5e   :  { %441 = vmatpush.msra.mxu0 %v234_v28  ;;  %460 = vmatpush.msra.mxu1 %v268_v29  ;;  %v523_v28 = vld [vmem:[%s863_s5 + $0x40] sm:$0xff] }
  0x5f   :  { %500 = vmatpush.msra.mxu3 %v332_v37  ;;  %481 = vmatpush.msra.mxu2 %v298_v40  ;;  %v543_v29 = vld [vmem:[%s863_s5 + $0xe0] sm:$0xff]  ;;  %v517_v40 = vld [vmem:[%s863_s5 + $0x10] sm:$0xff] }
  0x60   :  { %442 = vmatpush.msra.mxu0 %v232_v30  ;;  %461 = vmatpush.msra.mxu1 %v266_v31  ;;  %v522_v30 = vld [vmem:[%s863_s5 + $0x38] sm:$0xff]  ;;  %v539_v37 = vld [vmem:[%s863_s5 + $0xc0] sm:$0xff] }
  0x61   :  { %501 = vmatpush.msra.mxu3 %v330_v41  ;;  %482 = vmatpush.msra.mxu2 %v296_v44  ;;  %v542_v31 = vld [vmem:[%s863_s5 + $0xd8] sm:$0xff]  ;;  %v537_v41 = vld [vmem:[%s863_s5 + $0xb0] sm:$0xff]  ;;  %v515_v44 = vld [vmem:[%s863_s5] sm:$0xff] }
  0x62   :  { %443 = vmatpush.msra.mxu0 %v230_v34  ;;  %462 = vmatpush.msra.mxu1 %v264_v35  ;;  %v520_v34 = vld [vmem:[%s863_s5 + $0x28] sm:$0xff] }
  0x63   :  { %502 = vmatpush.msra.mxu3 %v328_v45  ;;  %483 = vmatpush.msra.mxu2 %v294_v48  ;;  %v540_v35 = vld [vmem:[%s863_s5 + $0xc8] sm:$0xff]  ;;  %v535_v45 = vld [vmem:[%s863_s5 + $0xa0] sm:$0xff] }
  0x64   :  { %444 = vmatpush.msra.mxu0 %v228_v38  ;;  %463 = vmatpush.msra.mxu1 %v262_v39  ;;  %v518_v38 = vld [vmem:[%s863_s5 + $0x18] sm:$0xff]  ;;  %v532_v48 = vld [vmem:[%s863_s5 + $0x88] sm:$0xff] }
  0x65   :  { %503 = vmatpush.msra.mxu3 %v326_v49  ;;  %484 = vmatpush.msra.mxu2 %v292_v52  ;;  %v538_v39 = vld [vmem:[%s863_s5 + $0xb8] sm:$0xff]  ;;  %v531_v49 = vld [vmem:[%s863_s5 + $0x80] sm:$0xff] }
  0x66   :  { %445 = vmatpush.msra.mxu0 %v226_v42  ;;  %464 = vmatpush.msra.mxu1 %v260_v43  ;;  %v516_v42 = vld [vmem:[%s863_s5 + $0x8] sm:$0xff] }
  0x67   :  { %504 = vmatpush.msra.mxu3 %v324_v53  ;;  %485 = vmatpush.msra.mxu2 %v290_v56  ;;  %v536_v43 = vld [vmem:[%s863_s5 + $0xa8] sm:$0xff] }
  0x68   :  { %446 = vmatpush.msra.mxu0 %v224_v46  ;;  %465 = vmatpush.msra.mxu1 %v258_v47  ;;  %v534_v46 = vld [vmem:[%s863_s5 + $0x98] sm:$0xff]  ;;  %v533_v47 = vld [vmem:[%s863_s5 + $0x90] sm:$0xff] }
  0x69   :  { %505 = vmatpush.msra.mxu3 %v322_v57  ;;  %486 = vmatpush.msra.mxu2 %v288_v59 }
  0x6a   :  { %447 = vmatpush.msra.mxu0 %v222_v50  ;;  %466 = vmatpush.msra.mxu1 %v256_v51  ;;  %v347_v50 = vld [vmem:[%s862_s4] sm:$0x3] }
  0x6b   :  { %506 = vmatpush.msra.mxu3 %v320_v60  ;;  %487 = vmatpush.msra.mxu2 %v286_v61  ;;  %v349_v51 = vperm.slane %v347_v50, 0  ;;  %v350_v56 = vperm.slane %v347_v50, 1 }
  0x6c   :  { %448 = vmatpush.msra.mxu0 %v220_v54  ;;  %467 = vmatpush.msra.mxu1 %v254_v55 }
  0x6d   :  { %507 = vmatpush.msra.mxu3 %v318_v62  ;;  %488 = vmatpush.msra.mxu2 %v284_v63 }
  0x6e   :  { %468 = vmatpush.msra.mxu1 %v252_v58 }
  0x6f   :  { %508 = vmatpush.msra.mxu3 %v316_v0 }
  0xa9   :  { %v152_v3 = vpop.f32.mrf.mxu0 }
  0xaa   :  { %v153_v5 = vadd.f32 %v152_v3, %v127_v2 }
  0xac   :  { %v215_v6 = vmax.f32 %v153_v5, 0.0  ;;  %v172_v7 = vpop.f32.mrf.mxu1 }
  0xad   :  { %v173_v9 = vadd.f32 %v172_v7, %v128_v4  ;;  %v548_v7 = vstv %s864_s6 }
  0xae   :  { %369 = vmatmul.f32.vlgmr.msrb.gmra.mxu0 %v215_v6 }
  0xaf   :  { %v216_v13 = vmax.f32 %v173_v9, 0.0  ;;  %549 = vmatpush.msrb.mxu0 %v530_v8 }
  0xb0   :  { %v192_v15 = vpop.f32.mrf.mxu2  ;;  %v212_v16 = vpop.f32.mrf.mxu3 }
  0xb1   :  { %v193_v18 = vadd.f32 %v192_v15, %v129_v10  ;;  %v213_v19 = vadd.f32 %v212_v16, %v130_v11  ;;  %389 = vmatmul.f32.vlgmr.msrb.gmra.mxu1 %v216_v13  ;;  %550 = vmatpush.msrb.mxu0 %v529_v12 }
  0xb2   :  { %569 = vmatpush.msrb.mxu1 %v546_v14 }
  0xb3   :  { %v217_v21 = vmax.f32 %v193_v18, 0.0  ;;  %v218_v22 = vmax.f32 %v213_v19, 0.0  ;;  %551 = vmatpush.msrb.mxu0 %v528_v17 }
  0xb4   :  { %570 = vmatpush.msrb.mxu1 %v545_v20 }
  0xb5   :  { %409 = vmatmul.f32.vlgmr.msrb.gmra.mxu2 %v217_v21  ;;  %429 = vmatmul.f32.vlgmr.msrb.gmra.mxu3 %v218_v22 }
  0xb6   :  { %449 = vmatmul.f32.vlgmr.msra.gmra.mxu0 %v215_v6  ;;  %571 = vmatpush.msrb.mxu1 %v544_v27 }
  0xb7   :  { %552 = vmatpush.msrb.mxu0 %v527_v23 }
  0xb8   :  { %572 = vmatpush.msrb.mxu1 %v543_v29 }
  0xb9   :  { %469 = vmatmul.f32.vlgmr.msra.gmra.mxu1 %v216_v13  ;;  %553 = vmatpush.msrb.mxu0 %v526_v24 }
  0xba   :  { %573 = vmatpush.msrb.mxu1 %v542_v31 }
  0xbb   :  { %554 = vmatpush.msrb.mxu0 %v525_v25 }
  0xbc   :  { %574 = vmatpush.msrb.mxu1 %v541_v33 }
  0xbd   :  { %489 = vmatmul.f32.vlgmr.msra.gmra.mxu2 %v217_v21  ;;  %509 = vmatmul.f32.vlgmr.msra.gmra.mxu3 %v218_v22 }
  0xbe   :  { %555 = vmatpush.msrb.mxu0 %v524_v26  ;;  %575 = vmatpush.msrb.mxu1 %v540_v35 }
  0xc0   :  { %556 = vmatpush.msrb.mxu0 %v523_v28  ;;  %576 = vmatpush.msrb.mxu1 %v539_v37 }
  0xc2   :  { %557 = vmatpush.msrb.mxu0 %v522_v30  ;;  %577 = vmatpush.msrb.mxu1 %v538_v39 }
  0xc4   :  { %558 = vmatpush.msrb.mxu0 %v521_v32  ;;  %578 = vmatpush.msrb.mxu1 %v537_v41 }
  0xc6   :  { %559 = vmatpush.msrb.mxu0 %v520_v34  ;;  %579 = vmatpush.msrb.mxu1 %v536_v43 }
  0xc8   :  { %560 = vmatpush.msrb.mxu0 %v519_v36  ;;  %580 = vmatpush.msrb.mxu1 %v535_v45 }
  0xca   :  { %561 = vmatpush.msrb.mxu0 %v518_v38  ;;  %581 = vmatpush.msrb.mxu1 %v534_v46 }
  0xcc   :  { %562 = vmatpush.msrb.mxu0 %v517_v40  ;;  %582 = vmatpush.msrb.mxu1 %v533_v47 }
  0xce   :  { %563 = vmatpush.msrb.mxu0 %v516_v42  ;;  %583 = vmatpush.msrb.mxu1 %v532_v48 }
  0xd0   :  { %564 = vmatpush.msrb.mxu0 %v515_v44  ;;  %584 = vmatpush.msrb.mxu1 %v531_v49 }
 0x12b   :  { %v370_v52 = vpop.f32.mrf.mxu0 }
 0x12c   :  { %v371_v53 = vadd.f32 %v370_v52, %v349_v51 }
 0x12e   :  { %v390_v54 = vpop.f32.mrf.mxu1 }
 0x12f   :  { %v391_v55 = vadd.f32 %v390_v54, %v371_v53 }
 0x133   :  { %v450_v57 = vpop.f32.mrf.mxu0 }
 0x134   :  { %v451_v61 = vadd.f32 %v450_v57, %v350_v56 }
 0x136   :  { %v470_v63 = vpop.f32.mrf.mxu1 }
 0x137   :  { %v471_v1 = vadd.f32 %v470_v63, %v451_v61 }
 0x138   :  { %v410_v58 = vpop.f32.mrf.mxu2  ;;  %v430_v59 = vpop.f32.mrf.mxu3 }
 0x139   :  { %v411_v60 = vadd.f32 %v410_v58, %v391_v55 }
 0x13b   :  { %v431_v62 = vadd.f32 %v430_v59, %v411_v60 }
 0x13d   :  { %v513_v0 = vmax.f32 %v431_v62, 0.0 }
 0x13f   :  { %565 = vmatmul.f32.vlgmr.msrb.gmra.mxu0 %v513_v0 }
 0x140   :  { %v490_v2 = vpop.f32.mrf.mxu2  ;;  %v510_v4 = vpop.f32.mrf.mxu3 }
 0x141   :  { %v491_v3 = vadd.f32 %v490_v2, %v471_v1 }
 0x143   :  { %v511_v5 = vadd.f32 %v510_v4, %v491_v3 }
 0x145   :  { %v514_v6 = vmax.f32 %v511_v5, 0.0 }
 0x147   :  { %585 = vmatmul.f32.vlgmr.msrb.gmra.mxu1 %v514_v6 }
 0x1bc   :  { %v566_v8 = vpop.f32.mrf.mxu0 }
 0x1bd   :  { %v567_v9 = vadd.f32 %v566_v8, %v548_v7 }
 0x1c4   :  { %v586_v10 = vpop.f32.mrf.mxu1 }
 0x1c5   :  { %v587_v11 = vadd.f32 %v586_v10, %v567_v9 }
 0x1c7   :  { %590 = vst.msk [vmem:[#allocation8] sm:$0xff] %vm589_vm0, %v587_v11 }
 0x1c8   :  { %601 = dma.vmem_to_hbm [thread:$0]  %s597_s28, 128, %s599_s8, [#allocation5]  }
 0x1c9   :  { %692 = dma.done.wait [#allocation5], 128  }
 0x1ca   :  { %693 = vsyncadd [#allocation5], 4294967168 }
 0x1cb   :  { %606 = vsyncpa [#allocation4], 1 }
 0x1cc   :  { %607 = vsyncpa [#allocation7], 1 }
 0x1cd   :  { %608 = vsyncpa [#allocation5], 1 }

</bundles_post_ra>
